<compile_context>
chip_gen: v7x
topology: tpu7x:2x2x1
jax: 0.10.0
libtpu: 0.0.40
codegen_flags: <defaults>
</compile_context>

<pallas_src>
import jax
import jax.numpy as jnp
from jax import lax
from jax.experimental import pallas as pl
from jax.experimental.pallas import tpu as pltpu


def _toeplitz_weights(w_hwio, scale, Wp):
    """Expand HWIO conv weights (+ folded BN scale) into a row-im2col GEMM
    matrix of shape (K*(Wp+K-1)*Ci, Wp*Co).

    Row index    = (dy * (Wp+K-1) + wx) * Ci + ci      (fused padded row slab)
    Column index = wp * Co + co                        (fused output row)
    """
    K, _, Ci, Co = w_hwio.shape
    WX = Wp + K - 1
    w = w_hwio * scale.reshape(1, 1, 1, Co)            # fold BN scale (linear)
    dx = jnp.arange(K)[:, None, None]
    wp = jnp.arange(Wp)[None, :, None]
    wx = jnp.arange(WX)[None, None, :]
    sel = (wx == wp + dx).astype(w.dtype)              # (K, Wp, WX) shift mask
    t = jnp.einsum('xpw,yxio->ywipo', sel, w)          # (K, WX, Ci, Wp, Co)
    return t.reshape(K * WX * Ci, Wp * Co)


def _make_down_kernel(K, Hp, Wp, Cin, Cmid, Cout, mxu_dtype):
    pad = K // 2
    halo = K - 1
    WX = Wp + halo
    WXCin, WXCmid = WX * Cin, WX * Cmid
    WpCin, WpCmid, WpCout = Wp * Cin, Wp * Cmid, Wp * Cout

    def kernel(x_ref, t1_ref, b1_ref, t2_ref, b2_ref, o_ref,
               pool_ref, mid_ref, p1_ref, p2_ref):
        # x_ref    : (nb, Hp, 4, Wp*Cin)   pooling parities on a leading axis
        # t1_ref   : (K*WX*Cin, Wp*Cmid)   Toeplitz conv1 weights (BN1 folded)
        # b1_ref   : (1, Wp*Cmid)          BN1 shift, lane-tiled
        # t2_ref   : (K*WX*Cmid, Wp*Cout)  Toeplitz conv2 weights (BN2 folded)
        # b2_ref   : (1, Wp*Cout)          BN2 shift, lane-tiled
        # o_ref    : (nb, Hp, Wp*Cout)     lane-fused output rows
        # pool_ref : (nb, Hp+halo, WX*Cin)   zero-halo pooled activations
        # mid_ref  : (nb, Hp+halo, WX*Cmid)  zero-halo mid activations
        # p1_ref   : (nb, Hp, K*WX*Cin)      row-im2col slab, conv1
        # p2_ref   : (nb, Hp, K*WX*Cmid)     row-im2col slab, conv2
        nb = x_ref.shape[0]
        R = nb * Hp

        # ---- MaxPool2d(2): 2x2 window lives on a leading axis --------------
        pooled = jnp.maximum(
            jnp.maximum(x_ref[:, :, 0, :], x_ref[:, :, 1, :]),
            jnp.maximum(x_ref[:, :, 2, :], x_ref[:, :, 3, :]))  # (nb,Hp,Wp*Cin)

        # ---- conv1 halo: zero only the border ring, write the interior -----
        pool_ref[:, pl.ds(0, pad), :] = jnp.zeros((nb, pad, WXCin), jnp.float32)
        pool_ref[:, pl.ds(Hp + pad, pad), :] = jnp.zeros((nb, pad, WXCin), jnp.float32)
        pool_ref[:, :, pl.ds(0, pad * Cin)] = jnp.zeros(
            (nb, Hp + halo, pad * Cin), jnp.float32)
        pool_ref[:, :, pl.ds((Wp + pad) * Cin, pad * Cin)] = jnp.zeros(
            (nb, Hp + halo, pad * Cin), jnp.float32)
        pool_ref[:, pl.ds(pad, Hp), pl.ds(pad * Cin, WpCin)] = pooled

        # ---- conv1 + BN1(scale folded) + ReLU : single MXU matmul ----------
        for dy in range(K):                       # K static slab writes
            p1_ref[:, :, pl.ds(dy * WXCin, WXCin)] = pool_ref[:, pl.ds(dy, Hp), :]
        h1 = jnp.dot(p1_ref[...].reshape(R, K * WXCin).astype(mxu_dtype),
                     t1_ref[...], preferred_element_type=jnp.float32)
        h1 = jnp.maximum(h1 + b1_ref[...], 0.0)   # (R, Wp*Cmid), f32

        # ---- conv2 halo ----------------------------------------------------
        mid_ref[:, pl.ds(0, pad), :] = jnp.zeros((nb, pad, WXCmid), jnp.float32)
        mid_ref[:, pl.ds(Hp + pad, pad), :] = jnp.zeros((nb, pad, WXCmid), jnp.float32)
        mid_ref[:, :, pl.ds(0, pad * Cmid)] = jnp.zeros(
            (nb, Hp + halo, pad * Cmid), jnp.float32)
        mid_ref[:, :, pl.ds((Wp + pad) * Cmid, pad * Cmid)] = jnp.zeros(
            (nb, Hp + halo, pad * Cmid), jnp.float32)
        mid_ref[:, pl.ds(pad, Hp), pl.ds(pad * Cmid, WpCmid)] = \
            h1.reshape(nb, Hp, WpCmid)

        # ---- conv2 + BN2(scale folded) + ReLU : single MXU matmul ----------
        for dy in range(K):
            p2_ref[:, :, pl.ds(dy * WXCmid, WXCmid)] = mid_ref[:, pl.ds(dy, Hp), :]
        h2 = jnp.dot(p2_ref[...].reshape(R, K * WXCmid).astype(mxu_dtype),
                     t2_ref[...], preferred_element_type=jnp.float32)
        h2 = jnp.maximum(h2 + b2_ref[...], 0.0)   # (R, Wp*Cout), f32

        # TODO(synk): Dropout2d(0.3) is identity in eval mode.
        o_ref[...] = h2.reshape(nb, Hp, WpCout).astype(o_ref.dtype)

    return kernel


def down_pallas(x_nchw, params, *, images_per_block=None,
                mxu_dtype=jnp.bfloat16):
    """Wrapper: NCHW in -> NCHW out.

    images_per_block=None folds the whole batch into one grid step (best on
    single-TC v5e/v6e).  On v7x pass images_per_block=N//2 so the "parallel"
    batch grid axis feeds both TensorCores.
    """
    w1, s1, b1, w2, s2, b2 = params              # HWIO weights, (1,C) scale/shift
    N, Cin, H, W = x_nchw.shape
    K = w1.shape[0]
    Cmid, Cout = w1.shape[3], w2.shape[3]
    assert K % 2 == 1, "odd kernel sizes reproduce PyTorch 'same' padding"
    assert H % 2 == 0 and W % 2 == 0, "MaxPool2d(2) path expects even H, W"
    Hp, Wp = H // 2, W // 2
    halo = K - 1
    WX = Wp + halo

    nb = N if images_per_block is None else images_per_block
    assert N % nb == 0
    n_blocks = N // nb

    # NCHW -> NHWC, then expose the 2x2 pooling window on a leading axis and
    # fuse (w, c) on the lane axis: (N, Hp, 4, Wp*Cin).  All wrapper-side XLA.
    x = jnp.transpose(x_nchw, (0, 2, 3, 1)).astype(jnp.float32)
    x = x.reshape(N, Hp, 2, Wp, 2, Cin)              # (n, hp, i, wp, j, c)
    x = jnp.transpose(x, (0, 1, 2, 4, 3, 5))         # (n, hp, i, j, wp, c)
    x = x.reshape(N, Hp, 4, Wp * Cin)

    # Toeplitz-expanded GEMM weights with BN scale folded in; bf16 MXU operands.
    t1 = _toeplitz_weights(w1, s1.reshape(-1), Wp).astype(mxu_dtype)
    t2 = _toeplitz_weights(w2, s2.reshape(-1), Wp).astype(mxu_dtype)
    # BN shifts tiled across the fused (wp, c) lane axis.
    b1_row = jnp.tile(b1.reshape(1, Cmid), (1, Wp)).astype(jnp.float32)
    b2_row = jnp.tile(b2.reshape(1, Cout), (1, Wp)).astype(jnp.float32)

    kernel = _make_down_kernel(K, Hp, Wp, Cin, Cmid, Cout, mxu_dtype)

    grid_spec = pltpu.PrefetchScalarGridSpec(
        num_scalar_prefetch=0,
        grid=(n_blocks,),
        in_specs=[
            pl.BlockSpec((nb, Hp, 4, Wp * Cin), lambda n: (n, 0, 0, 0)),
            pl.BlockSpec((K * WX * Cin, Wp * Cmid), lambda n: (0, 0)),
            pl.BlockSpec((1, Wp * Cmid), lambda n: (0, 0)),
            pl.BlockSpec((K * WX * Cmid, Wp * Cout), lambda n: (0, 0)),
            pl.BlockSpec((1, Wp * Cout), lambda n: (0, 0)),
        ],
        out_specs=pl.BlockSpec((nb, Hp, Wp * Cout), lambda n: (n, 0, 0)),
        scratch_shapes=[
            pltpu.VMEM((nb, Hp + halo, WX * Cin), jnp.float32),
            pltpu.VMEM((nb, Hp + halo, WX * Cmid), jnp.float32),
            pltpu.VMEM((nb, Hp, K * WX * Cin), jnp.float32),
            pltpu.VMEM((nb, Hp, K * WX * Cmid), jnp.float32),
        ],
    )

    out = pl.pallas_call(
        kernel,
        out_shape=jax.ShapeDtypeStruct((N, Hp, Wp * Cout), jnp.float32),
        grid_spec=grid_spec,
        compiler_params=pltpu.CompilerParams(
            dimension_semantics=("parallel",),
            vmem_limit_bytes=32 * 1024 * 1024),
    )(x, t1, b1_row, t2, b2_row)

    out = out.reshape(N, Hp, Wp, Cout)               # un-fuse (w, c) in XLA
    return jnp.transpose(out, (0, 3, 1, 2))          # NHWC -> NCHW


def init_params(key, in_channels, out_channels, kernel_size=3):
    """Deterministic parameter init mirroring the module's __init__ shapes."""
    mid_channels = (out_channels + in_channels) // 2
    ks = jax.random.split(key, 10)
    eps = 1e-5

    w1 = 0.1 * jax.random.normal(
        ks[0], (kernel_size, kernel_size, in_channels, mid_channels), jnp.float32)
    w2 = 0.1 * jax.random.normal(
        ks[1], (kernel_size, kernel_size, mid_channels, out_channels), jnp.float32)

    g1 = 1.0 + 0.1 * jax.random.normal(ks[2], (mid_channels,), jnp.float32)
    be1 = 0.1 * jax.random.normal(ks[3], (mid_channels,), jnp.float32)
    rm1 = 0.05 * jax.random.normal(ks[4], (mid_channels,), jnp.float32)
    rv1 = jnp.abs(1.0 + 0.1 * jax.random.normal(ks[5], (mid_channels,), jnp.float32))

    g2 = 1.0 + 0.1 * jax.random.normal(ks[6], (out_channels,), jnp.float32)
    be2 = 0.1 * jax.random.normal(ks[7], (out_channels,), jnp.float32)
    rm2 = 0.05 * jax.random.normal(ks[8], (out_channels,), jnp.float32)
    rv2 = jnp.abs(1.0 + 0.1 * jax.random.normal(ks[9], (out_channels,), jnp.float32))

    # Fold BN (eval): y = x * scale + shift
    s1 = g1 / jnp.sqrt(rv1 + eps)
    b1 = be1 - rm1 * s1
    s2 = g2 / jnp.sqrt(rv2 + eps)
    b2 = be2 - rm2 * s2

    return (w1, s1.reshape(1, -1), b1.reshape(1, -1),
            w2, s2.reshape(1, -1), b2.reshape(1, -1))


def down_reference(x_nchw, w1, s1, b1, w2, s2, b2):
    """Pure-JAX reference (same eval-mode semantics), f32-accurate convs."""
    xp = lax.reduce_window(x_nchw, -jnp.inf, lax.max,
                           (1, 1, 2, 2), (1, 1, 2, 2), 'VALID')
    dn = ('NCHW', 'HWIO', 'NCHW')
    h = lax.conv_general_dilated(xp, w1, (1, 1), 'SAME', dimension_numbers=dn,
                                 precision=lax.Precision.HIGHEST)
    h = jnp.maximum(h * s1.reshape(1, -1, 1, 1) + b1.reshape(1, -1, 1, 1), 0.0)
    h = lax.conv_general_dilated(h, w2, (1, 1), 'SAME', dimension_numbers=dn,
                                 precision=lax.Precision.HIGHEST)
    h = jnp.maximum(h * s2.reshape(1, -1, 1, 1) + b2.reshape(1, -1, 1, 1), 0.0)
    return h


if __name__ == "__main__":
    key = jax.random.PRNGKey(0)
    k_x, k_p = jax.random.split(key)

    # Down(in_channels=4, out_channels=8) on a (2, 4, 16, 16) NCHW input.
    N, Cin, H, W = 2, 4, 16, 16
    Cout = 8
    x = jax.random.normal(k_x, (N, Cin, H, W), jnp.float32)
    params = init_params(k_p, Cin, Cout)

    out = down_pallas(x, params)           # bf16 MXU operands, f32 accumulate
    out = jax.block_until_ready(out)
    assert out.shape == (N, Cout, H // 2, W // 2), out.shape

    ref = down_reference(x, *params)
    max_err = float(jnp.max(jnp.abs(out - ref)))
    # Tolerance budget: bf16 operands (rel eps 2^-9) over contractions of 36/54
    # non-zero terms through two conv layers give expected max|err| ~1e-2..3e-2
    # at these magnitudes; structural bugs (wrong pooling/halo/tap/BN) produce
    # O(0.5..2) discrepancies, far above this threshold.
    if not bool(jnp.allclose(out, ref, atol=5e-2, rtol=5e-2)):
        raise AssertionError(
            f"Pallas kernel mismatch vs reference, max|err|={max_err}")

    print("KERNEL_OK")
</pallas_src>

<mosaic_0001>
module attributes {stable_mosaic.version = 11 : i64} {
  func.func @kernel(%arg0: i32, %arg1: memref<2x8x4x32xf32, #tpu.memory_space<vmem>>, %arg2: memref<120x48xbf16, #tpu.memory_space<vmem>>, %arg3: memref<1x48xf32, #tpu.memory_space<vmem>>, %arg4: memref<180x64xbf16, #tpu.memory_space<vmem>>, %arg5: memref<1x64xf32, #tpu.memory_space<vmem>>, %arg6: memref<2x8x64xf32, #tpu.memory_space<vmem>>, %arg7: memref<2x10x40xf32, #tpu.memory_space<vmem>>, %arg8: memref<2x10x60xf32, #tpu.memory_space<vmem>>, %arg9: memref<2x8x120xf32, #tpu.memory_space<vmem>>, %arg10: memref<2x8x180xf32, #tpu.memory_space<vmem>>) attributes {dimension_semantics = [#tpu.dimension_semantics<parallel>], iteration_bounds = array<i64: 1>, scalar_prefetch = 0 : i64, scratch_operands = 4 : i64, tpu.core_type = #tpu.core_type<tc>, window_params = [{transform_indices = @transform_0, window_bounds = array<i64: 2, 8, 4, 32>}, {pipeline_mode = #tpu.pipeline_mode<synchronous>, transform_indices = @transform_1, window_bounds = array<i64: 120, 48>}, {pipeline_mode = #tpu.pipeline_mode<synchronous>, transform_indices = @transform_2, window_bounds = array<i64: 1, 48>}, {pipeline_mode = #tpu.pipeline_mode<synchronous>, transform_indices = @transform_3, window_bounds = array<i64: 180, 64>}, {pipeline_mode = #tpu.pipeline_mode<synchronous>, transform_indices = @transform_4, window_bounds = array<i64: 1, 64>}, {transform_indices = @transform_5, window_bounds = array<i64: 2, 8, 64>}]} {
    %c0 = arith.constant 0 : index
    %c0_0 = arith.constant 0 : index
    %c0_1 = arith.constant 0 : index
    %c0_2 = arith.constant 0 : index
    %0 = vector.load %arg1[%c0, %c0_0, %c0_1, %c0_2] : memref<2x8x4x32xf32, #tpu.memory_space<vmem>>, vector<2x8x1x32xf32>
    %1 = vector.shape_cast %0 : vector<2x8x1x32xf32> to vector<2x8x32xf32>
    %c0_3 = arith.constant 0 : index
    %c0_4 = arith.constant 0 : index
    %c1 = arith.constant 1 : index
    %c0_5 = arith.constant 0 : index
    %2 = vector.load %arg1[%c0_3, %c0_4, %c1, %c0_5] : memref<2x8x4x32xf32, #tpu.memory_space<vmem>>, vector<2x8x1x32xf32>
    %3 = vector.shape_cast %2 : vector<2x8x1x32xf32> to vector<2x8x32xf32>
    %4 = arith.maximumf %1, %3 : vector<2x8x32xf32>
    %c0_6 = arith.constant 0 : index
    %c0_7 = arith.constant 0 : index
    %c2 = arith.constant 2 : index
    %c0_8 = arith.constant 0 : index
    %5 = vector.load %arg1[%c0_6, %c0_7, %c2, %c0_8] : memref<2x8x4x32xf32, #tpu.memory_space<vmem>>, vector<2x8x1x32xf32>
    %6 = vector.shape_cast %5 : vector<2x8x1x32xf32> to vector<2x8x32xf32>
    %c0_9 = arith.constant 0 : index
    %c0_10 = arith.constant 0 : index
    %c3 = arith.constant 3 : index
    %c0_11 = arith.constant 0 : index
    %7 = vector.load %arg1[%c0_9, %c0_10, %c3, %c0_11] : memref<2x8x4x32xf32, #tpu.memory_space<vmem>>, vector<2x8x1x32xf32>
    %8 = vector.shape_cast %7 : vector<2x8x1x32xf32> to vector<2x8x32xf32>
    %9 = arith.maximumf %6, %8 : vector<2x8x32xf32>
    %10 = arith.maximumf %4, %9 : vector<2x8x32xf32>
    %cst = arith.constant 0.000000e+00 : f32
    %11 = vector.broadcast %cst : f32 to vector<2x1x40xf32>
    %c0_12 = arith.constant 0 : index
    %c0_13 = arith.constant 0 : index
    %c0_14 = arith.constant 0 : index
    %12 = vector.load %arg7[%c0_12, %c0_13, %c0_14] : memref<2x10x40xf32, #tpu.memory_space<vmem>>, vector<2x1x40xf32>
    tpu.vector_store %arg7[%c0_12, %c0_13, %c0_14], %11 {strides = array<i32>} : memref<2x10x40xf32, #tpu.memory_space<vmem>>, vector<2x1x40xf32>,
    %cst_15 = arith.constant 0.000000e+00 : f32
    %13 = vector.broadcast %cst_15 : f32 to vector<2x1x40xf32>
    %c0_16 = arith.constant 0 : index
    %c9 = arith.constant 9 : index
    %c0_17 = arith.constant 0 : index
    %14 = vector.load %arg7[%c0_16, %c9, %c0_17] : memref<2x10x40xf32, #tpu.memory_space<vmem>>, vector<2x1x40xf32>
    tpu.vector_store %arg7[%c0_16, %c9, %c0_17], %13 {strides = array<i32>} : memref<2x10x40xf32, #tpu.memory_space<vmem>>, vector<2x1x40xf32>,
    %cst_18 = arith.constant 0.000000e+00 : f32
    %15 = vector.broadcast %cst_18 : f32 to vector<2x10x4xf32>
    %c0_19 = arith.constant 0 : index
    %c0_20 = arith.constant 0 : index
    %c0_21 = arith.constant 0 : index
    %16 = vector.load %arg7[%c0_19, %c0_20, %c0_21] : memref<2x10x40xf32, #tpu.memory_space<vmem>>, vector<2x10x4xf32>
    tpu.vector_store %arg7[%c0_19, %c0_20, %c0_21], %15 {strides = array<i32>} : memref<2x10x40xf32, #tpu.memory_space<vmem>>, vector<2x10x4xf32>,
    %cst_22 = arith.constant 0.000000e+00 : f32
    %17 = vector.broadcast %cst_22 : f32 to vector<2x10x4xf32>
    %c0_23 = arith.constant 0 : index
    %c0_24 = arith.constant 0 : index
    %c36 = arith.constant 36 : index
    %18 = vector.load %arg7[%c0_23, %c0_24, %c36] : memref<2x10x40xf32, #tpu.memory_space<vmem>>, vector<2x10x4xf32>
    tpu.vector_store %arg7[%c0_23, %c0_24, %c36], %17 {strides = array<i32>} : memref<2x10x40xf32, #tpu.memory_space<vmem>>, vector<2x10x4xf32>,
    %c0_25 = arith.constant 0 : index
    %c1_26 = arith.constant 1 : index
    %c4 = arith.constant 4 : index
    %19 = vector.load %arg7[%c0_25, %c1_26, %c4] : memref<2x10x40xf32, #tpu.memory_space<vmem>>, vector<2x8x32xf32>
    tpu.vector_store %arg7[%c0_25, %c1_26, %c4], %10 {strides = array<i32>} : memref<2x10x40xf32, #tpu.memory_space<vmem>>, vector<2x8x32xf32>,
    %c0_27 = arith.constant 0 : index
    %c0_28 = arith.constant 0 : index
    %c0_29 = arith.constant 0 : index
    %20 = vector.load %arg7[%c0_27, %c0_28, %c0_29] : memref<2x10x40xf32, #tpu.memory_space<vmem>>, vector<2x8x40xf32>
    %c0_30 = arith.constant 0 : index
    %c0_31 = arith.constant 0 : index
    %c0_32 = arith.constant 0 : index
    %21 = vector.load %arg9[%c0_30, %c0_31, %c0_32] : memref<2x8x120xf32, #tpu.memory_space<vmem>>, vector<2x8x40xf32>
    tpu.vector_store %arg9[%c0_30, %c0_31, %c0_32], %20 {strides = array<i32>} : memref<2x8x120xf32, #tpu.memory_space<vmem>>, vector<2x8x40xf32>,
    %c0_33 = arith.constant 0 : index
    %c1_34 = arith.constant 1 : index
    %c0_35 = arith.constant 0 : index
    %22 = vector.load %arg7[%c0_33, %c1_34, %c0_35] : memref<2x10x40xf32, #tpu.memory_space<vmem>>, vector<2x8x40xf32>
    %c0_36 = arith.constant 0 : index
    %c0_37 = arith.constant 0 : index
    %c40 = arith.constant 40 : index
    %23 = vector.load %arg9[%c0_36, %c0_37, %c40] : memref<2x8x120xf32, #tpu.memory_space<vmem>>, vector<2x8x40xf32>
    tpu.vector_store %arg9[%c0_36, %c0_37, %c40], %22 {strides = array<i32>} : memref<2x8x120xf32, #tpu.memory_space<vmem>>, vector<2x8x40xf32>,
    %c0_38 = arith.constant 0 : index
    %c2_39 = arith.constant 2 : index
    %c0_40 = arith.constant 0 : index
    %24 = vector.load %arg7[%c0_38, %c2_39, %c0_40] : memref<2x10x40xf32, #tpu.memory_space<vmem>>, vector<2x8x40xf32>
    %c0_41 = arith.constant 0 : index
    %c0_42 = arith.constant 0 : index
    %c80 = arith.constant 80 : index
    %25 = vector.load %arg9[%c0_41, %c0_42, %c80] : memref<2x8x120xf32, #tpu.memory_space<vmem>>, vector<2x8x40xf32>
    tpu.vector_store %arg9[%c0_41, %c0_42, %c80], %24 {strides = array<i32>} : memref<2x8x120xf32, #tpu.memory_space<vmem>>, vector<2x8x40xf32>,
    %c0_43 = arith.constant 0 : index
    %c0_44 = arith.constant 0 : index
    %c0_45 = arith.constant 0 : index
    %26 = vector.load %arg9[%c0_43, %c0_44, %c0_45] : memref<2x8x120xf32, #tpu.memory_space<vmem>>, vector<2x8x120xf32>
    %27 = vector.shape_cast %26 : vector<2x8x120xf32> to vector<16x120xf32>
    %28 = arith.truncf %27 : vector<16x120xf32> to vector<16x120xbf16>
    %c0_46 = arith.constant 0 : index
    %c0_47 = arith.constant 0 : index
    %29 = vector.load %arg2[%c0_46, %c0_47] : memref<120x48xbf16, #tpu.memory_space<vmem>>, vector<120x48xbf16>
    %cst_48 = arith.constant dense<0.000000e+00> : vector<16x48xf32>
    %30 = tpu.matmul %28, %29, %cst_48 {dimension_numbers = #tpu.dot_dimension_numbers<[1], [0], [0], [1], [0, 0, 1, 1], [], []>} : vector<16x120xbf16>, vector<120x48xbf16>, vector<16x48xf32> -> vector<16x48xf32>
    %c0_49 = arith.constant 0 : index
    %c0_50 = arith.constant 0 : index
    %31 = vector.load %arg3[%c0_49, %c0_50] : memref<1x48xf32, #tpu.memory_space<vmem>>, vector<1x48xf32>
    %32 = vector.broadcast %31 : vector<1x48xf32> to vector<16x48xf32>
    %33 = arith.addf %30, %32 : vector<16x48xf32>
    %cst_51 = arith.constant 0.000000e+00 : f32
    %34 = vector.broadcast %cst_51 : f32 to vector<16x48xf32>
    %35 = arith.maximumf %33, %34 : vector<16x48xf32>
    %cst_52 = arith.constant 0.000000e+00 : f32
    %36 = vector.broadcast %cst_52 : f32 to vector<2x1x60xf32>
    %c0_53 = arith.constant 0 : index
    %c0_54 = arith.constant 0 : index
    %c0_55 = arith.constant 0 : index
    %37 = vector.load %arg8[%c0_53, %c0_54, %c0_55] : memref<2x10x60xf32, #tpu.memory_space<vmem>>, vector<2x1x60xf32>
    tpu.vector_store %arg8[%c0_53, %c0_54, %c0_55], %36 {strides = array<i32>} : memref<2x10x60xf32, #tpu.memory_space<vmem>>, vector<2x1x60xf32>,
    %cst_56 = arith.constant 0.000000e+00 : f32
    %38 = vector.broadcast %cst_56 : f32 to vector<2x1x60xf32>
    %c0_57 = arith.constant 0 : index
    %c9_58 = arith.constant 9 : index
    %c0_59 = arith.constant 0 : index
    %39 = vector.load %arg8[%c0_57, %c9_58, %c0_59] : memref<2x10x60xf32, #tpu.memory_space<vmem>>, vector<2x1x60xf32>
    tpu.vector_store %arg8[%c0_57, %c9_58, %c0_59], %38 {strides = array<i32>} : memref<2x10x60xf32, #tpu.memory_space<vmem>>, vector<2x1x60xf32>,
    %cst_60 = arith.constant 0.000000e+00 : f32
    %40 = vector.broadcast %cst_60 : f32 to vector<2x10x6xf32>
    %c0_61 = arith.constant 0 : index
    %c0_62 = arith.constant 0 : index
    %c0_63 = arith.constant 0 : index
    %41 = vector.load %arg8[%c0_61, %c0_62, %c0_63] : memref<2x10x60xf32, #tpu.memory_space<vmem>>, vector<2x10x6xf32>
    tpu.vector_store %arg8[%c0_61, %c0_62, %c0_63], %40 {strides = array<i32>} : memref<2x10x60xf32, #tpu.memory_space<vmem>>, vector<2x10x6xf32>,
    %cst_64 = arith.constant 0.000000e+00 : f32
    %42 = vector.broadcast %cst_64 : f32 to vector<2x10x6xf32>
    %c0_65 = arith.constant 0 : index
    %c0_66 = arith.constant 0 : index
    %c54 = arith.constant 54 : index
    %43 = vector.load %arg8[%c0_65, %c0_66, %c54] : memref<2x10x60xf32, #tpu.memory_space<vmem>>, vector<2x10x6xf32>
    tpu.vector_store %arg8[%c0_65, %c0_66, %c54], %42 {strides = array<i32>} : memref<2x10x60xf32, #tpu.memory_space<vmem>>, vector<2x10x6xf32>,
    %44 = vector.shape_cast %35 : vector<16x48xf32> to vector<2x8x48xf32>
    %c0_67 = arith.constant 0 : index
    %c1_68 = arith.constant 1 : index
    %c6 = arith.constant 6 : index
    %45 = vector.load %arg8[%c0_67, %c1_68, %c6] : memref<2x10x60xf32, #tpu.memory_space<vmem>>, vector<2x8x48xf32>
    tpu.vector_store %arg8[%c0_67, %c1_68, %c6], %44 {strides = array<i32>} : memref<2x10x60xf32, #tpu.memory_space<vmem>>, vector<2x8x48xf32>,
    %c0_69 = arith.constant 0 : index
    %c0_70 = arith.constant 0 : index
    %c0_71 = arith.constant 0 : index
    %46 = vector.load %arg8[%c0_69, %c0_70, %c0_71] : memref<2x10x60xf32, #tpu.memory_space<vmem>>, vector<2x8x60xf32>
    %c0_72 = arith.constant 0 : index
    %c0_73 = arith.constant 0 : index
    %c0_74 = arith.constant 0 : index
    %47 = vector.load %arg10[%c0_72, %c0_73, %c0_74] : memref<2x8x180xf32, #tpu.memory_space<vmem>>, vector<2x8x60xf32>
    tpu.vector_store %arg10[%c0_72, %c0_73, %c0_74], %46 {strides = array<i32>} : memref<2x8x180xf32, #tpu.memory_space<vmem>>, vector<2x8x60xf32>,
    %c0_75 = arith.constant 0 : index
    %c1_76 = arith.constant 1 : index
    %c0_77 = arith.constant 0 : index
    %48 = vector.load %arg8[%c0_75, %c1_76, %c0_77] : memref<2x10x60xf32, #tpu.memory_space<vmem>>, vector<2x8x60xf32>
    %c0_78 = arith.constant 0 : index
    %c0_79 = arith.constant 0 : index
    %c60 = arith.constant 60 : index
    %49 = vector.load %arg10[%c0_78, %c0_79, %c60] : memref<2x8x180xf32, #tpu.memory_space<vmem>>, vector<2x8x60xf32>
    tpu.vector_store %arg10[%c0_78, %c0_79, %c60], %48 {strides = array<i32>} : memref<2x8x180xf32, #tpu.memory_space<vmem>>, vector<2x8x60xf32>,
    %c0_80 = arith.constant 0 : index
    %c2_81 = arith.constant 2 : index
    %c0_82 = arith.constant 0 : index
    %50 = vector.load %arg8[%c0_80, %c2_81, %c0_82] : memref<2x10x60xf32, #tpu.memory_space<vmem>>, vector<2x8x60xf32>
    %c0_83 = arith.constant 0 : index
    %c0_84 = arith.constant 0 : index
    %c120 = arith.constant 120 : index
    %51 = vector.load %arg10[%c0_83, %c0_84, %c120] : memref<2x8x180xf32, #tpu.memory_space<vmem>>, vector<2x8x60xf32>
    tpu.vector_store %arg10[%c0_83, %c0_84, %c120], %50 {strides = array<i32>} : memref<2x8x180xf32, #tpu.memory_space<vmem>>, vector<2x8x60xf32>,
    %c0_85 = arith.constant 0 : index
    %c0_86 = arith.constant 0 : index
    %c0_87 = arith.constant 0 : index
    %52 = vector.load %arg10[%c0_85, %c0_86, %c0_87] : memref<2x8x180xf32, #tpu.memory_space<vmem>>, vector<2x8x180xf32>
    %53 = vector.shape_cast %52 : vector<2x8x180xf32> to vector<16x180xf32>
    %54 = arith.truncf %53 : vector<16x180xf32> to vector<16x180xbf16>
    %c0_88 = arith.constant 0 : index
    %c0_89 = arith.constant 0 : index
    %55 = vector.load %arg4[%c0_88, %c0_89] : memref<180x64xbf16, #tpu.memory_space<vmem>>, vector<180x64xbf16>
    %cst_90 = arith.constant dense<0.000000e+00> : vector<16x64xf32>
    %56 = tpu.matmul %54, %55, %cst_90 {dimension_numbers = #tpu.dot_dimension_numbers<[1], [0], [0], [1], [0, 0, 1, 1], [], []>} : vector<16x180xbf16>, vector<180x64xbf16>, vector<16x64xf32> -> vector<16x64xf32>
    %c0_91 = arith.constant 0 : index
    %c0_92 = arith.constant 0 : index
    %57 = vector.load %arg5[%c0_91, %c0_92] : memref<1x64xf32, #tpu.memory_space<vmem>>, vector<1x64xf32>
    %58 = vector.broadcast %57 : vector<1x64xf32> to vector<16x64xf32>
    %59 = arith.addf %56, %58 : vector<16x64xf32>
    %cst_93 = arith.constant 0.000000e+00 : f32
    %60 = vector.broadcast %cst_93 : f32 to vector<16x64xf32>
    %61 = arith.maximumf %59, %60 : vector<16x64xf32>
    %62 = vector.shape_cast %61 : vector<16x64xf32> to vector<2x8x64xf32>
    %c0_94 = arith.constant 0 : index
    %c0_95 = arith.constant 0 : index
    %c0_96 = arith.constant 0 : index
    %63 = vector.load %arg6[%c0_94, %c0_95, %c0_96] : memref<2x8x64xf32, #tpu.memory_space<vmem>>, vector<2x8x64xf32>
    tpu.vector_store %arg6[%c0_94, %c0_95, %c0_96], %62 {strides = array<i32>} : memref<2x8x64xf32, #tpu.memory_space<vmem>>, vector<2x8x64xf32>,
    return
  }
  func.func @transform_0(%arg0: i32) -> (i32, i32, i32, i32) {
    %c0_i32 = arith.constant 0 : i32
    %c0_i32_0 = arith.constant 0 : i32
    %c0_i32_1 = arith.constant 0 : i32
    %c0_i32_2 = arith.constant 0 : i32
    return %arg0, %c0_i32, %c0_i32_0, %c0_i32_1 : i32, i32, i32, i32
  }
  func.func @transform_1(%arg0: i32) -> (i32, i32) {
    %c0_i32 = arith.constant 0 : i32
    %c0_i32_0 = arith.constant 0 : i32
    %c0_i32_1 = arith.constant 0 : i32
    return %c0_i32, %c0_i32_0 : i32, i32
  }
  func.func @transform_2(%arg0: i32) -> (i32, i32) {
    %c0_i32 = arith.constant 0 : i32
    %c0_i32_0 = arith.constant 0 : i32
    %c0_i32_1 = arith.constant 0 : i32
    return %c0_i32, %c0_i32_0 : i32, i32
  }
  func.func @transform_3(%arg0: i32) -> (i32, i32) {
    %c0_i32 = arith.constant 0 : i32
    %c0_i32_0 = arith.constant 0 : i32
    %c0_i32_1 = arith.constant 0 : i32
    return %c0_i32, %c0_i32_0 : i32, i32
  }
  func.func @transform_4(%arg0: i32) -> (i32, i32) {
    %c0_i32 = arith.constant 0 : i32
    %c0_i32_0 = arith.constant 0 : i32
    %c0_i32_1 = arith.constant 0 : i32
    return %c0_i32, %c0_i32_0 : i32, i32
  }
  func.func @transform_5(%arg0: i32) -> (i32, i32, i32) {
    %c0_i32 = arith.constant 0 : i32
    %c0_i32_0 = arith.constant 0 : i32
    %c0_i32_1 = arith.constant 0 : i32
    return %arg0, %c0_i32, %c0_i32_0 : i32, i32, i32
  }
}

</mosaic_0001>

<bundles_post_ra>
// kernel: tpu_custom_call.1
= control target key start
LH: loop header
LB: loop body
LE: loop exit
PB: predicated region body
PF: predicated region fallthrough
CT: control target
= control target key end

     0   :  { %vm168_vm0 = vcmask 1041409   ;;  %vm171_vm1 = vcmask 1042434   ;;  %vm174_vm2 = vcmask 1043459   ;;  %vm177_vm3 = vcmask 1044484   ;;  %s708_s7 = smov 4   ;;  %s1073_s0 = inlined_call_operand.vmem [shape: f32[2,8,4,32], index: 0, kind: input, shape index: {}]   ;;  %s1074_s1 = inlined_call_operand.vmem [shape: bf16[120,48], index: 1, kind: input, shape index: {}]   ;;  %s1075_s2 = inlined_call_operand.vmem [shape: f32[1,48], index: 2, kind: input, shape index: {}]   ;;  %s1076_s3 = inlined_call_operand.vmem [shape: bf16[180,64], index: 3, kind: input, shape index: {}]   ;;  %s1077_s4 = inlined_call_operand.vmem [shape: f32[1,64], index: 4, kind: input, shape index: {}]   ;;  %s1078_s5 = inlined_call_operand.hbm [shape: f32[2,8,64], index: 5, kind: output, shape index: {}]  }
   0x1   :  { %v22_v0 = vld [vmem:[%s1073_s0] sm:$0x1]  ;;  %v23_v1 = vld [vmem:[%s1073_s0 + $0x4] sm:$0x1]  ;;  %v24_v2 = vld [vmem:[%s1073_s0 + $0x8] sm:$0x1] }
   0x2   :  { %v38_v3 = vld [vmem:[%s1073_s0 + $0x1] sm:$0x1]  ;;  %v25_v4 = vld [vmem:[%s1073_s0 + $0xc] sm:$0x1]  ;;  %v26_v5 = vld [vmem:[%s1073_s0 + $0x10] sm:$0x1] }
   0x3   :  { %v27_v6 = vld [vmem:[%s1073_s0 + $0x14] sm:$0x1]  ;;  %v28_v7 = vld [vmem:[%s1073_s0 + $0x18] sm:$0x1]  ;;  %v39_v8 = vld [vmem:[%s1073_s0 + $0x5] sm:$0x1]  ;;  %v54_v21 = vmax.f32 %v22_v0, %v38_v3 }
   0x4   :  { %v40_v9 = vld [vmem:[%s1073_s0 + $0x9] sm:$0x1]  ;;  %v41_v10 = vld [vmem:[%s1073_s0 + $0xd] sm:$0x1]  ;;  %v29_v11 = vld [vmem:[%s1073_s0 + $0x1c] sm:$0x1]  ;;  %v55_v22 = vmax.f32 %v23_v1, %v39_v8 }
   0x5   :  { %v42_v12 = vld [vmem:[%s1073_s0 + $0x11] sm:$0x1]  ;;  %v43_v13 = vld [vmem:[%s1073_s0 + $0x15] sm:$0x1]  ;;  %v44_v14 = vld [vmem:[%s1073_s0 + $0x19] sm:$0x1]  ;;  %v56_v23 = vmax.f32 %v24_v2, %v40_v9  ;;  %v57_v27 = vmax.f32 %v25_v4, %v41_v10 }
   0x6   :  { %v45_v15 = vld [vmem:[%s1073_s0 + $0x1d] sm:$0x1]  ;;  %v70_v16 = vld [vmem:[%s1073_s0 + $0x2] sm:$0x1]  ;;  %v71_v17 = vld [vmem:[%s1073_s0 + $0x6] sm:$0x1]  ;;  %v58_v28 = vmax.f32 %v26_v5, %v42_v12  ;;  %v59_v29 = vmax.f32 %v27_v6, %v43_v13  ;;  %v60_v30 = vmax.f32 %v28_v7, %v44_v14 }
   0x7   :  { %v72_v18 = vld [vmem:[%s1073_s0 + $0xa] sm:$0x1]  ;;  %v73_v19 = vld [vmem:[%s1073_s0 + $0xe] sm:$0x1]  ;;  %v74_v20 = vld [vmem:[%s1073_s0 + $0x12] sm:$0x1]  ;;  %v61_v34 = vmax.f32 %v29_v11, %v45_v15 }
   0x8   :  { %v75_v24 = vld [vmem:[%s1073_s0 + $0x16] sm:$0x1]  ;;  %v76_v25 = vld [vmem:[%s1073_s0 + $0x1a] sm:$0x1]  ;;  %v77_v26 = vld [vmem:[%s1073_s0 + $0x1e] sm:$0x1] }
   0x9   :  { %v86_v31 = vld [vmem:[%s1073_s0 + $0x3] sm:$0x1]  ;;  %v87_v32 = vld [vmem:[%s1073_s0 + $0x7] sm:$0x1]  ;;  %v88_v33 = vld [vmem:[%s1073_s0 + $0xb] sm:$0x1] }
   0xa   :  { %v89_v35 = vld [vmem:[%s1073_s0 + $0xf] sm:$0x1]  ;;  %v90_v36 = vld [vmem:[%s1073_s0 + $0x13] sm:$0x1]  ;;  %v91_v37 = vld [vmem:[%s1073_s0 + $0x17] sm:$0x1]  ;;  %v102_v38 = vmax.f32 %v70_v16, %v86_v31  ;;  %v103_v39 = vmax.f32 %v71_v17, %v87_v32  ;;  %v104_v40 = vmax.f32 %v72_v18, %v88_v33 }
   0xb   :  { %v92_v41 = vld [vmem:[%s1073_s0 + $0x1b] sm:$0x1]  ;;  %v93_v42 = vld [vmem:[%s1073_s0 + $0x1f] sm:$0x1]  ;;  %v105_v43 = vmax.f32 %v73_v19, %v89_v35  ;;  %v106_v44 = vmax.f32 %v74_v20, %v90_v36  ;;  %v107_v45 = vmax.f32 %v75_v24, %v91_v37  ;;  %vm180_vm4 = vcmask 1045509  }
   0xc   :  { %v108_v46 = vmax.f32 %v76_v25, %v92_v41  ;;  %v109_v47 = vmax.f32 %v77_v26, %v93_v42  ;;  %v118_v48 = vmax.f32 %v54_v21, %v102_v38  ;;  %v119_v49 = vmax.f32 %v55_v22, %v103_v39  ;;  %v30_v62 = vld [vmem:[%s1073_s0 + $0x20] sm:$0x1]  ;;  %v46_v63 = vld [vmem:[%s1073_s0 + $0x21] sm:$0x1]  ;;  %v31_v2 = vld [vmem:[%s1073_s0 + $0x24] sm:$0x1] }
   0xd   :  { %v120_v50 = vmax.f32 %v56_v23, %v104_v40  ;;  %v121_v51 = vmax.f32 %v57_v27, %v105_v43  ;;  %v122_v52 = vmax.f32 %v58_v28, %v106_v44  ;;  %v123_v53 = vmax.f32 %v59_v29, %v107_v45  ;;  %v32_v3 = vld [vmem:[%s1073_s0 + $0x28] sm:$0x1]  ;;  %v33_v4 = vld [vmem:[%s1073_s0 + $0x2c] sm:$0x1]  ;;  %v47_v5 = vld [vmem:[%s1073_s0 + $0x25] sm:$0x1] }
   0xe   :  { %v124_v54 = vmax.f32 %v60_v30, %v108_v46  ;;  %v125_v55 = vmax.f32 %v61_v34, %v109_v47  ;;  %v167_v56 = vrot.slane %v119_v49, 7  ;;  %vm183_vm5 = vcmask 1046534   ;;  %v48_v6 = vld [vmem:[%s1073_s0 + $0x29] sm:$0x1]  ;;  %v34_v9 = vld [vmem:[%s1073_s0 + $0x30] sm:$0x1] }
   0xf   :  { %v170_v57 = vrot.slane %v120_v50, 6  ;;  %v173_v58 = vrot.slane %v121_v51, 5  ;;  %v176_v59 = vrot.slane %v122_v52, 4  ;;  %v179_v61 = vrot.slane %v123_v53, 3  ;;  %v35_v10 = vld [vmem:[%s1073_s0 + $0x34] sm:$0x1] }
  0x10   :  { %v169_v60 = vsel %vm168_vm0, %v167_v56, %v118_v48  ;;  %v182_v1 = vrot.slane %v124_v54, 2  ;;  %v185_v8 = vrot.slane %v125_v55, 1  ;;  %vm186_vm6 = vcmask 1047559   ;;  %v36_v11 = vld [vmem:[%s1073_s0 + $0x38] sm:$0x1] }
  0x11   :  { %v172_v0 = vsel %vm171_vm1, %v170_v57, %v169_v60  ;;  %v49_v12 = vld [vmem:[%s1073_s0 + $0x2d] sm:$0x1]  ;;  %v50_v13 = vld [vmem:[%s1073_s0 + $0x31] sm:$0x1]  ;;  %v37_v15 = vld [vmem:[%s1073_s0 + $0x3c] sm:$0x1]  ;;  %v62_v24 = vmax.f32 %v30_v62, %v46_v63  ;;  %v63_v29 = vmax.f32 %v31_v2, %v47_v5  ;;  %v64_v30 = vmax.f32 %v32_v3, %v48_v6 }
  0x12   :  { %v175_v7 = vsel %vm174_vm2, %v173_v58, %v172_v0  ;;  %v51_v16 = vld [vmem:[%s1073_s0 + $0x35] sm:$0x1]  ;;  %v52_v17 = vld [vmem:[%s1073_s0 + $0x39] sm:$0x1]  ;;  %v53_v18 = vld [vmem:[%s1073_s0 + $0x3d] sm:$0x1]  ;;  %v65_v31 = vmax.f32 %v33_v4, %v49_v12  ;;  %v66_v35 = vmax.f32 %v34_v9, %v50_v13 }
  0x13   :  { %v178_v14 = vsel %vm177_vm3, %v176_v59, %v175_v7  ;;  %v78_v20 = vld [vmem:[%s1073_s0 + $0x22] sm:$0x1]  ;;  %v79_v21 = vld [vmem:[%s1073_s0 + $0x26] sm:$0x1]  ;;  %v80_v22 = vld [vmem:[%s1073_s0 + $0x2a] sm:$0x1]  ;;  %v67_v36 = vmax.f32 %v35_v10, %v51_v16  ;;  %v68_v37 = vmax.f32 %v36_v11, %v52_v17  ;;  %v69_v42 = vmax.f32 %v37_v15, %v53_v18 }
  0x14   :  { %v181_v19 = vsel %vm180_vm4, %v179_v61, %v178_v14  ;;  %v81_v25 = vld [vmem:[%s1073_s0 + $0x2e] sm:$0x1]  ;;  %v82_v26 = vld [vmem:[%s1073_s0 + $0x32] sm:$0x1]  ;;  %v83_v27 = vld [vmem:[%s1073_s0 + $0x36] sm:$0x1] }
  0x15   :  { %v184_v23 = vsel %vm183_vm5, %v182_v1, %v181_v19  ;;  %v84_v32 = vld [vmem:[%s1073_s0 + $0x3a] sm:$0x1]  ;;  %v85_v33 = vld [vmem:[%s1073_s0 + $0x3e] sm:$0x1]  ;;  %v94_v34 = vld [vmem:[%s1073_s0 + $0x23] sm:$0x1] }
  0x16   :  { %v187_v28 = vsel %vm186_vm6, %v185_v8, %v184_v23  ;;  %v95_v38 = vld [vmem:[%s1073_s0 + $0x27] sm:$0x1]  ;;  %v96_v39 = vld [vmem:[%s1073_s0 + $0x2b] sm:$0x1]  ;;  %v97_v40 = vld [vmem:[%s1073_s0 + $0x2f] sm:$0x1]  ;;  %v110_v41 = vmax.f32 %v78_v20, %v94_v34 }
  0x17   :  { %202 = vrot.lane.b32.xlu0 %v187_v28, %s708_s7  ;;  %v98_v43 = vld [vmem:[%s1073_s0 + $0x33] sm:$0x1]  ;;  %v99_v44 = vld [vmem:[%s1073_s0 + $0x37] sm:$0x1]  ;;  %v100_v45 = vld [vmem:[%s1073_s0 + $0x3b] sm:$0x1]  ;;  %v111_v46 = vmax.f32 %v79_v21, %v95_v38  ;;  %v112_v47 = vmax.f32 %v80_v22, %v96_v39  ;;  %v113_v48 = vmax.f32 %v81_v25, %v97_v40 }
  0x18   :  { %v101_v49 = vld [vmem:[%s1073_s0 + $0x3f] sm:$0x1]  ;;  %v114_v50 = vmax.f32 %v82_v26, %v98_v43  ;;  %v115_v51 = vmax.f32 %v83_v27, %v99_v44  ;;  %v116_v52 = vmax.f32 %v84_v32, %v100_v45  ;;  %v126_v53 = vmax.f32 %v62_v24, %v110_v41  ;;  %v664_v13 = vld [vmem:[%s1074_s1] sm:$0xff]   ;;  %v665_v14 = vld [vmem:[%s1074_s1 + $0x8] sm:$0xff]  }
  0x19   :  { %v117_v54 = vmax.f32 %v85_v33, %v101_v49  ;;  %v127_v55 = vmax.f32 %v63_v29, %v111_v46  ;;  %v128_v56 = vmax.f32 %v64_v30, %v112_v47  ;;  %v129_v57 = vmax.f32 %v65_v31, %v113_v48  ;;  %v666_v15 = vld [vmem:[%s1074_s1 + $0x10] sm:$0xff]  }
  0x1a   :  { %v130_v58 = vmax.f32 %v66_v35, %v114_v50  ;;  %v131_v59 = vmax.f32 %v67_v36, %v115_v51  ;;  %v132_v60 = vmax.f32 %v68_v37, %v116_v52  ;;  %vm134_vm7 = vcmask 319488  }
  0x1b   :  { %v133_v61 = vmax.f32 %v69_v42, %v117_v54  ;;  %v188_v62 = vrot.slane %v127_v55, 7  ;;  %v190_v63 = vrot.slane %v128_v56, 6  ;;  %v192_v0 = vrot.slane %v129_v57, 5 }
  0x1c   :  { %v194_v1 = vrot.slane %v130_v58, 4  ;;  %v196_v3 = vrot.slane %v131_v59, 3  ;;  %v709_v4 = vmov 0.0   ;;  %vm139_vm8 = vcmask 31744  }
  0x1d   :  { %v189_v2 = vsel %vm168_vm0, %v188_v62, %v126_v53  ;;  %135 = vst.msk [vmem:[#allocation2] sm:$0x1] %vm134_vm7, %v709_v4  ;;  %137 = vst.msk [vmem:[#allocation2 + $0x9] sm:$0x1] %vm134_vm7, %v709_v4  ;;  %vm141_vm9 = vcmask 25600   ;;  %632 = vmatprep.subr.bf16.mxu0 %v709_v4  ;;  %v198_v6 = vrot.slane %v132_v60, 2 }
  0x1e   :  { %136 = vst.msk [vmem:[#allocation2 + $0x10] sm:$0x1] %vm134_vm7, %v709_v4  ;;  %138 = vst.msk [vmem:[#allocation2 + $0x19] sm:$0x1] %vm134_vm7, %v709_v4  ;;  %v191_v5 = vsel %vm171_vm1, %v190_v63, %v189_v2  ;;  %vm145_vm10 = vcmask 326944   ;;  %vm147_vm11 = vcmask 320800   ;;  %633 = vmatpush3.bf16.msra.mxu0 %v664_v13 }
  0x1f   :  { %140 = vst.msk [vmem:[#allocation2] sm:$0xff] %vm139_vm8, %v709_v4  ;;  %143 = vst.msk [vmem:[#allocation2 + $0x10] sm:$0xff] %vm139_vm8, %v709_v4  ;;  %v193_v7 = vsel %vm174_vm2, %v192_v0, %v191_v5  ;;  %v200_v8 = vrot.slane %v133_v61, 1  ;;  %634 = vmatprep.subr.bf16.mxu0 %v709_v4 }
  0x20   :  { %142 = vst.msk [vmem:[#allocation2 + $0x8] sm:$0x3] %vm141_vm9, %v709_v4  ;;  %144 = vst.msk [vmem:[#allocation2 + $0x18] sm:$0x3] %vm141_vm9, %v709_v4  ;;  %v195_v9 = vsel %vm177_vm3, %v194_v1, %v193_v7 }
  0x21   :  { %146 = vst.msk [vmem:[#allocation2] sm:$0xff] %vm145_vm10, %v709_v4  ;;  %149 = vst.msk [vmem:[#allocation2 + $0x10] sm:$0xff] %vm145_vm10, %v709_v4  ;;  %v197_v10 = vsel %vm180_vm4, %v196_v3, %v195_v9 }
  0x22   :  { %148 = vst.msk [vmem:[#allocation2 + $0x8] sm:$0x3] %vm147_vm11, %v709_v4  ;;  %150 = vst.msk [vmem:[#allocation2 + $0x18] sm:$0x3] %vm147_vm11, %v709_v4  ;;  %v199_v11 = vsel %vm183_vm5, %v198_v6, %v197_v10  ;;  %635 = vmatpush3.bf16.msra.mxu0 %v665_v14 }
  0x23   :  { %v201_v12 = vsel %vm186_vm6, %v200_v8, %v199_v11  ;;  %636 = vmatprep.subr.bf16.mxu0 %v709_v4 }
  0x24   :  { %204 = vrot.lane.b32.xlu0 %v201_v12, %s708_s7 }
  0x25   :  { %10 = vsyncpa [#allocation7], 0  ;;  %v667_v16 = vld [vmem:[%s1074_s1 + $0x18] sm:$0xff]   ;;  %v668_v17 = vld [vmem:[%s1074_s1 + $0x20] sm:$0xff]   ;;  %vm208_vm12 = vcmask 293920   ;;  %vm213_vm13 = vcmask 326656  }
  0x26   :  { %637 = vmatpush3.bf16.msra.mxu0 %v666_v15  ;;  %s710_s6 = smov 80   ;;  %s711_s7 = smov 40   ;;  %v669_v22 = vld [vmem:[%s1074_s1 + $0x28] sm:$0xff]   ;;  %v670_v24 = vld [vmem:[%s1074_s1 + $0x30] sm:$0xff]   ;;  %v671_v25 = vld [vmem:[%s1074_s1 + $0x38] ss:$0 sps:$4 sm:$0xff]  }
  0x27   :  { %638 = vmatprep.subr.bf16.mxu0 %v709_v4  ;;  %vm316_vm14 = vcmask 1043456   ;;  %vm712_vm15 = vmmov 0   ;;  %vm226_vm0 = vcmask 654656   ;;  %vm239_vm1 = vcmask 982656   ;;  %v599_v37 = vld [vmem:[%s1075_s2] ss:$0 sm:$0xff] }
  0x28   :  { %648 = vmatprep.mubr.msk.bf16.mxu0 %vm712_vm15, %v709_v4  ;;  %v318_v26 = vsel %vm316_vm14, %v671_v25, 0  ;;  %vm312_vm2 = vcmask 982016   ;;  %vm363_vm3 = vcmask 483328   ;;  %vm368_vm4 = vcmask 48128   ;;  %s713_s15 = smov 6   ;;  %v672_v46 = vld [vmem:[%s1076_s3] sm:$0xff]  }
  0x29   :  { %vm370_vm5 = vcmask 41984   ;;  %vm374_vm6 = vcmask 490928   ;;  %364 = vst.msk [vmem:[#allocation3] sm:$0x1] %vm363_vm3, %v709_v4  ;;  %366 = vst.msk [vmem:[#allocation3 + $0x9] sm:$0x1] %vm363_vm3, %v709_v4 }
  0x2a   :  { %639 = vmatpush3.bf16.msra.mxu0 %v667_v16  ;;  %vm376_vm7 = vcmask 484784   ;;  %365 = vst.msk [vmem:[#allocation3 + $0x10] sm:$0x1] %vm363_vm3, %v709_v4  ;;  %367 = vst.msk [vmem:[#allocation3 + $0x19] sm:$0x1] %vm363_vm3, %v709_v4  ;;  %v714_v47 = vmov 0  }
  0x2b   :  { %640 = vmatprep.subr.bf16.mxu0 %v709_v4  ;;  %369 = vst.msk [vmem:[#allocation3] sm:$0xff] %vm368_vm4, %v709_v4  ;;  %372 = vst.msk [vmem:[#allocation3 + $0x10] sm:$0xff] %vm368_vm4, %v709_v4  ;;  %537 = vmatprep.subr.bf16.mxu1 %v714_v47  ;;  %v673_v48 = vld [vmem:[%s1076_s3 + $0x8] sm:$0xff]   ;;  %v674_v49 = vld [vmem:[%s1076_s3 + $0x10] sm:$0xff]   ;;  %vm388_vm8 = vcmask 441392   ;;  %vm533_vm9 = vcmask 1041408  }
  0x2c   :  { %371 = vst.msk [vmem:[#allocation3 + $0x8] sm:$0x3] %vm370_vm5, %v709_v4  ;;  %373 = vst.msk [vmem:[#allocation3 + $0x18] sm:$0x3] %vm370_vm5, %v709_v4  ;;  %538 = vmatpush1.bf16.msra.mxu1 %v672_v46  ;;  %v675_v50 = vld [vmem:[%s1076_s3 + $0x18] sm:$0xff]   ;;  %v676_v51 = vld [vmem:[%s1076_s3 + $0x20] sm:$0xff]  }
  0x2d   :  { %375 = vst.msk [vmem:[#allocation3] sm:$0xff] %vm374_vm6, %v709_v4  ;;  %378 = vst.msk [vmem:[#allocation3 + $0x10] sm:$0xff] %vm374_vm6, %v709_v4  ;;  %539 = vmatprep.subr.bf16.mxu1 %v714_v47  ;;  %v677_v52 = vld [vmem:[%s1076_s3 + $0x28] sm:$0xff]   ;;  %v678_v53 = vld [vmem:[%s1076_s3 + $0x30] sm:$0xff]   ;;  %vm393_vm10 = vcmask 490496   ;;  %s715_s13 = smov 60  }
  0x2e   :  { %641 = vmatpush3.bf16.msra.mxu0 %v668_v17  ;;  %377 = vst.msk [vmem:[#allocation3 + $0x8] sm:$0x3] %vm376_vm7, %v709_v4  ;;  %379 = vst.msk [vmem:[#allocation3 + $0x18] sm:$0x3] %vm376_vm7, %v709_v4  ;;  %v679_v54 = vld [vmem:[%s1076_s3 + $0x38] sm:$0xff]   ;;  %v680_v55 = vld [vmem:[%s1076_s3 + $0x40] sm:$0xff]  }
  0x2f   :  { %642 = vmatprep.subr.bf16.mxu0 %v709_v4  ;;  %v681_v57 = vld [vmem:[%s1076_s3 + $0x48] sm:$0xff]   ;;  %v682_v59 = vld [vmem:[%s1076_s3 + $0x50] sm:$0xff]   ;;  %v683_v60 = vld [vmem:[%s1076_s3 + $0x58] ss:$0 sps:$4 sm:$0x33]   ;;  %s716_s1 = smov 120  }
  0x30   :  { %540 = vmatpush1.bf16.msra.mxu1 %v673_v48  ;;  %v535_v61 = vsel %vm533_vm9, %v683_v60, 0  ;;  %vm406_vm11 = vcmask 982496   ;;  %v609_v14 = vld [vmem:[%s1077_s4] ss:$0 sm:$0xff]  ;;  %vm580_vm14 = vcmask 523264  }
  0x31   :  { %541 = vmatprep.subr.bf16.mxu1 %v714_v47 }
  0x32   :  { %643 = vmatpush3.bf16.msra.mxu0 %v669_v22 }
  0x33   :  { %644 = vmatprep.subr.bf16.mxu0 %v709_v4 }
  0x34   :  { %542 = vmatpush1.bf16.msra.mxu1 %v674_v49 }
  0x35   :  { %543 = vmatprep.subr.bf16.mxu1 %v714_v47 }
  0x36   :  { %645 = vmatpush3.bf16.msra.mxu0 %v670_v24 }
  0x37   :  { %646 = vmatprep.subr.bf16.mxu0 %v709_v4 }
  0x38   :  { %544 = vmatpush1.bf16.msra.mxu1 %v675_v50 }
  0x39   :  { %545 = vmatprep.subr.bf16.mxu1 %v714_v47 }
  0x3a   :  { %647 = vmatpush3.bf16.msra.mxu0 %v318_v26 }
  0x3c   :  { %546 = vmatpush1.bf16.msra.mxu1 %v676_v51 }
  0x3d   :  { %547 = vmatprep.subr.bf16.mxu1 %v714_v47 }
  0x40   :  { %548 = vmatpush1.bf16.msra.mxu1 %v677_v52 }
  0x41   :  { %549 = vmatprep.subr.bf16.mxu1 %v714_v47 }
  0x44   :  { %550 = vmatpush1.bf16.msra.mxu1 %v678_v53 }
  0x45   :  { %551 = vmatprep.subr.bf16.mxu1 %v714_v47 }
  0x48   :  { %552 = vmatpush1.bf16.msra.mxu1 %v679_v54 }
  0x49   :  { %553 = vmatprep.subr.bf16.mxu1 %v714_v47 }
  0x4c   :  { %554 = vmatpush1.bf16.msra.mxu1 %v680_v55 }
  0x4d   :  { %555 = vmatprep.subr.bf16.mxu1 %v714_v47 }
  0x50   :  { %556 = vmatpush1.bf16.msra.mxu1 %v681_v57 }
  0x51   :  { %557 = vmatprep.subr.bf16.mxu1 %v714_v47 }
  0x54   :  { %558 = vmatpush1.bf16.msra.mxu1 %v682_v59 }
  0x55   :  { %559 = vmatprep.subr.bf16.mxu1 %v714_v47 }
  0x58   :  { %560 = vmatpush1.bf16.msra.mxu1 %v535_v61 }
  0x89   :  { %v203_v18 = vpop.permute.xlu0 %202 }
  0x8a   :  { %209 = vst.msk [vmem:[#allocation2 + $0x1] sm:$0xff] %vm208_vm12, %v203_v18 }
  0x91   :  { %v229_v19 = vld [vmem:[#allocation2 + $0x2] sm:$0xff] }
  0x92   :  { %v216_v20 = vld [vmem:[#allocation2 + $0x1] sm:$0xff]  ;;  %233 = vrot.lane.b32.xlu0 %v229_v19, %s710_s6 }
  0x93   :  { %v211_v21 = vld [vmem:[#allocation2] sm:$0xff]  ;;  %220 = vrot.lane.b32.xlu1 %v216_v20, %s711_s7 }
  0x94   :  { %214 = vst.msk [vmem:[#allocation4] sm:$0xff] %vm213_vm13, %v211_v21 }
  0x96   :  { %v205_v23 = vpop.permute.xlu0 %204 }
  0x97   :  { %210 = vst.msk [vmem:[#allocation2 + $0x11] sm:$0xff] %vm208_vm12, %v205_v23  ;;  %vm419_vm12 = vcmask 1048512  }
  0x9e   :  { %v217_v27 = vld [vmem:[#allocation2 + $0x11] sm:$0xff] }
  0x9f   :  { %v212_v28 = vld [vmem:[#allocation2 + $0x10] sm:$0xff]  ;;  %222 = vrot.lane.b32.xlu1 %v217_v27, %s711_s7 }
  0xa0   :  { %215 = vst.msk [vmem:[#allocation4 + $0x8] sm:$0xff] %vm213_vm13, %v212_v28  ;;  %v230_v29 = vld [vmem:[#allocation2 + $0x12] sm:$0xff]  ;;  %vm421_vm13 = vcmask 424960  }
  0xa3   :  { %235 = vrot.lane.b32.xlu1 %v230_v29, %s710_s6 }
 0x104   :  { %v234_v31 = vpop.permute.xlu0 %233 }
 0x105   :  { %v221_v30 = vpop.permute.xlu1 %220 }
 0x106   :  { %227 = vst.msk [vmem:[#allocation4] sm:$0xff] %vm226_vm0, %v221_v30 }
 0x107   :  { %240 = vst.msk [vmem:[#allocation4] sm:$0xff] %vm239_vm1, %v234_v31 }
 0x10e   :  { %v242_v34 = vld [vmem:[#allocation4] sm:$0xff] }
 0x111   :  { %v223_v32 = vpop.permute.xlu1 %222 }
 0x112   :  { %228 = vst.msk [vmem:[#allocation4 + $0x8] sm:$0xff] %vm226_vm0, %v223_v32 }
 0x115   :  { %v236_v33 = vpop.permute.xlu1 %235 }
 0x116   :  { %241 = vst.msk [vmem:[#allocation4 + $0x8] sm:$0xff] %vm239_vm1, %v236_v33 }
 0x11d   :  { %v243_v35 = vld [vmem:[#allocation4 + $0x8] sm:$0xff] }
 0x11e   :  { %v244_v36 = vpack.c.bf16 %v243_v35, %v242_v34 }
 0x120   :  { %649 = vmatmul.mubr.msk.bf16.vlgmr.msra.gmra.mrb[0].mxu0 %vm312_vm2, %v244_v36 }
 0x1f3   :  { %v354_v38 = vpop.f32.mrb[0].mxu0 }
 0x1f4   :  { %v355_v39 = vadd.f32 %v599_v37, %v354_v38  ;;  %v650_v40 = vpop.f32.mrb[1].mxu0 }
 0x1f5   :  { %v357_v41 = vpop.f32.mrb[2].mxu0 }
 0x1f6   :  { %v361_v42 = vmax.f32 %v355_v39, 0.0  ;;  %v358_v43 = vadd.f32 %v599_v37, %v357_v41  ;;  %v651_v44 = vpop.f32.mrb[3].mxu0 }
 0x1f8   :  { %v362_v45 = vmax.f32 %v358_v43, 0.0  ;;  %382 = vrot.lane.b32.xlu0 %v361_v42, %s713_s15 }
 0x1fa   :  { %384 = vrot.lane.b32.xlu1 %v362_v45, %s713_s15  ;;  %s717_s15 = smov [#allocation6]  }
 0x1fb   :  { %s588_s16 = sshll.u32 %s717_s15, 4  ;;  %s589_s16 = int_to_ptr.vmem [resolvable:$true] %s588_s16 }
 0x1fc   :  { %s684_s17 = scalar_lea.vmem %s589_s16, 256  ;;  %p689_p1 = scmp.lt.s32.totalorder %s589_s16, %s589_s16 }
 0x1fd   :  { %p685_p0 = scmp.ne.s32.totalorder %s589_s16, %s684_s17  ;;  %p690_p2 = scmp.lt.s32.totalorder %s684_s17, %s684_s17 }
 0x1ff   :  { %p691_p3 = por %p690_p2, %p689_p1 }
 0x201   :  { %p692_p4 = pnand %p691_p3, %p685_p0 }
 0x26a   :  { %v383_v56 = vpop.permute.xlu0 %382 }
 0x26b   :  { %389 = vst.msk [vmem:[#allocation3 + $0x1] sm:$0xff] %vm388_vm8, %v383_v56 }
 0x26c   :  { %v385_v58 = vpop.permute.xlu1 %384 }
 0x26d   :  { %390 = vst.msk [vmem:[#allocation3 + $0x11] sm:$0xff] %vm388_vm8, %v385_v58 }
 0x272   :  { %v396_v62 = vld [vmem:[#allocation3 + $0x1] sm:$0xff] }
 0x273   :  { %v391_v63 = vld [vmem:[#allocation3] sm:$0xff]  ;;  %400 = vrot.lane.b32.xlu0 %v396_v62, %s715_s13 }
 0x274   :  { %394 = vst.msk [vmem:[#allocation5] sm:$0xff] %vm393_vm10, %v391_v63  ;;  %v397_v0 = vld [vmem:[#allocation3 + $0x11] sm:$0xff]  ;;  %v409_v2 = vld [vmem:[#allocation3 + $0x2] sm:$0xff] }
 0x275   :  { %v392_v1 = vld [vmem:[#allocation3 + $0x10] sm:$0xff]  ;;  %402 = vrot.lane.b32.xlu1 %v397_v0, %s715_s13 }
 0x276   :  { %395 = vst.msk [vmem:[#allocation5 + $0x10] sm:$0xff] %vm393_vm10, %v392_v1  ;;  %v410_v3 = vld [vmem:[#allocation3 + $0x12] sm:$0xff] }
 0x277   :  { %413 = vrot.lane.b32.xlu0 %v409_v2, %s716_s1 }
 0x279   :  { %415 = vrot.lane.b32.xlu1 %v410_v3, %s716_s1 }
 0x2e5   :  { %v401_v4 = vpop.permute.xlu0 %400 }
 0x2e6   :  { %407 = vst.msk [vmem:[#allocation5] sm:$0xff] %vm406_vm11, %v401_v4 }
 0x2e7   :  { %v403_v5 = vpop.permute.xlu1 %402 }
 0x2e8   :  { %408 = vst.msk [vmem:[#allocation5 + $0x10] sm:$0xff] %vm406_vm11, %v403_v5 }
 0x2e9   :  { %v414_v6 = vpop.permute.xlu0 %413 }
 0x2ea   :  { %420 = vst.msk [vmem:[#allocation5] sm:$0xff] %vm419_vm12, %v414_v6 }
 0x2eb   :  { %422 = vst.msk [vmem:[#allocation5 + $0x8] sm:$0xff] %vm421_vm13, %v414_v6  ;;  %v416_v7 = vpop.permute.xlu1 %415 }
 0x2ec   :  { %423 = vst.msk [vmem:[#allocation5 + $0x10] sm:$0xff] %vm419_vm12, %v416_v7 }
 0x2ed   :  { %424 = vst.msk [vmem:[#allocation5 + $0x18] sm:$0xff] %vm421_vm13, %v416_v7 }
 0x2f1   :  { %v425_v10 = vld [vmem:[#allocation5] sm:$0xff] }
 0x2f2   :  { %v426_v8 = vld [vmem:[#allocation5 + $0x8] sm:$0xff] }
 0x2f3   :  { %v427_v11 = vld [vmem:[#allocation5 + $0x10] sm:$0xff] }
 0x2f4   :  { %v428_v9 = vld [vmem:[#allocation5 + $0x18] sm:$0xff]  ;;  %v429_v13 = vpack.c.bf16 %v427_v11, %v425_v10 }
 0x2f5   :  { %v430_v12 = vpack.c.bf16 %v428_v9, %v426_v8 }
 0x2f7   :  { %622 = vmatprep.mubr.msk.bf16.mxu1 %vm421_vm13, %v430_v12 }
 0x2f8   :  { %570 = vmatmul.mubr.bf16.vlgmr.msra.gmra.mrb[0].mxu1 %v429_v13 }
 0x3cb   :  { %v571_v15 = vpop.f32.mrb[0].mxu1 }
 0x3cc   :  { %v572_v16 = vadd.f32 %v609_v14, %v571_v15  ;;  %v573_v17 = vpop.f32.mrb[1].mxu1 }
 0x3cd   :  { %v574_v18 = vpop.f32.mrb[2].mxu1 }
 0x3ce   :  { %v578_v19 = vmax.f32 %v572_v16, 0.0  ;;  %v575_v20 = vadd.f32 %v609_v14, %v574_v18  ;;  %v576_v21 = vpop.f32.mrb[3].mxu1 }
 0x3d0   :  { %581 = vst.msk [vmem:[#allocation6] sm:$0xff] %vm580_vm14, %v578_v19  ;;  %v579_v22 = vmax.f32 %v575_v20, 0.0 }
 0x3d2   :  { %582 = vst.msk [vmem:[#allocation6 + $0x8] sm:$0xff] %vm580_vm14, %v579_v22 }
 0x3d3   :  { %695 = shalt.err (!%p692_p4)
}
 0x3d4   :  { %s696_s2 = scalar_lea.hbm %s1078_s5, 256 }
 0x3d5   :  { %p697_p5 = scmp.ne.s32.totalorder %s1078_s5, %s696_s2  ;;  %p700_p6 = scmp.lt.u32.totalorder %s696_s2, %s1078_s5 }
 0x3d7   :  { %p702_p7 = pnand %p700_p6, %p697_p5 }
 0x3d9   :  { %705 = shalt.err (!%p702_p7)
}
 0x3da   :  { %s718_s22 = smov 128   ;;  %s719_s23 = smov 8  }
 0x3db   :  { %594 = dma.vmem_to_hbm [thread:$0]  %s589_s16, 256, %s1078_s5, [#allocation7], %s718_s22, %s718_s22, %s719_s23  }
 0x3dc   :  { %706 = dma.done.wait [#allocation7], 256  }
 0x3dd   :  { %707 = vsyncadd [#allocation7], 4294967040 }
 0x3de   :  { %598 = vsyncpa [#allocation7], 1 }

</bundles_post_ra>
